<compile_context>
chip_gen: v6e
topology: v6e:2x2x1
jax: 0.10.0
libtpu: 0.0.40
codegen_flags: <defaults>
</compile_context>

<pallas_src>
import jax
import jax.numpy as jnp
from jax import lax
from jax.experimental import pallas as pl
from jax.experimental.pallas import tpu as pltpu


def _self_attention_kernel(x_ref,        # VMEM (Bt, L, H) f32
                           w_ref,        # VMEM (1, H)     f32   (resident)
                           b_ref,        # SMEM (1,)       f32
                           len_ref,      # VMEM (Bt, 1)    i32
                           rep_ref,      # VMEM (Bt, H)    f32   out
                           scores_ref):  # VMEM (Bt, L)    f32   out (lane-dense)
    x = x_ref[...]                                   # (Bt, L, H)
    bt, L, _ = x.shape

    # attention head: Linear(H -> 1) + tanh, as VPU multiply + lane reduce
    # (avoids a 1-column MXU matmul and the lane-padded (H, 1) operand).
    w_row = w_ref[...]                               # (1, H), broadcasts over (Bt, L, H)
    logits = jnp.sum(x * w_row, axis=-1) + b_ref[0]  # (Bt, L)
    s = jnp.tanh(logits)

    # masked softmax over the sequence axis (mask fused; single normalization).
    lens = len_ref[...]                              # (Bt, 1) int32
    idx = lax.broadcasted_iota(jnp.int32, (bt, L), 1)
    mask = idx < lens                                # (Bt, L) bool
    s_masked = jnp.where(mask, s, jnp.float32(-1e30))
    m = jnp.max(s_masked, axis=-1, keepdims=True)
    e = jnp.exp(s_masked - m)                        # padded positions underflow to 0
    denom = jnp.sum(e, axis=-1, keepdims=True)
    scores = e * pl.reciprocal(denom, approx=False)  # (Bt, L)

    scores_ref[...] = scores
    # weighted representation: sum_L x * p   -> (Bt, H)
    rep_ref[...] = jnp.sum(x * scores[..., None], axis=1)


def _choose_block_b(B, L, H, itemsize=4, vmem_tile_budget=4 << 20):
    """Pick the batch block so one x tile is a few MiB (double-buffers well
    within the 64 MiB v7x / 128 MiB v5e-v6e VMEM) and BlockSpec sublane rules
    (block dim multiple of 8, or equal to the full dim) are respected."""
    per_row = max(L * H * itemsize, 1)
    bt = max(1, min(B, vmem_tile_budget // per_row))
    if bt < B:
        bt = max(8, (bt // 8) * 8)                   # multiple-of-8 sublane block
    elif B >= 16 and B % 16 == 0 and (B // 2) * per_row >= (512 << 10):
        bt = B // 2                                  # keep >=2 parallel steps for v7x's 2 TCs
    return bt


def self_attention_forward(x, lengths, w, bias):
    """x: (B, L, H) f32, lengths: (B,) i32, w: (1, H) f32, bias: (1,) f32.

    Returns (representations (B, H), scores (B, L)) — matching the PyTorch
    module's forward (for B > 1, where .squeeze() keeps the batch dim).
    """
    B, L, H = x.shape
    bt = _choose_block_b(B, L, H, jnp.dtype(x.dtype).itemsize)
    grid = (pl.cdiv(B, bt),)

    lengths2d = lengths.reshape(B, 1).astype(jnp.int32)

    grid_spec = pltpu.PrefetchScalarGridSpec(
        num_scalar_prefetch=0,
        grid=grid,
        in_specs=[
            pl.BlockSpec((bt, L, H), lambda b: (b, 0, 0)),          # x  (batched tile)
            pl.BlockSpec((1, H), lambda b: (0, 0)),                 # w  (resident row)
            pl.BlockSpec(memory_space=pltpu.MemorySpace.SMEM),      # bias (scalar)
            pl.BlockSpec((bt, 1), lambda b: (b, 0)),                # lengths column
        ],
        out_specs=[
            pl.BlockSpec((bt, H), lambda b: (b, 0)),                # representations
            pl.BlockSpec((bt, L), lambda b: (b, 0)),                # scores (lane-dense)
        ],
    )

    rep, scores = pl.pallas_call(
        _self_attention_kernel,
        grid_spec=grid_spec,
        out_shape=(
            jax.ShapeDtypeStruct((B, H), jnp.float32),
            jax.ShapeDtypeStruct((B, L), jnp.float32),
        ),
        compiler_params=pltpu.CompilerParams(
            dimension_semantics=("parallel",),
            vmem_limit_bytes=32 * 1024 * 1024,
        ),
    )(x, w, bias, lengths2d)

    return rep, scores


def _reference(x, lengths, w, bias):
    """Pure-JAX reference mirroring the PyTorch forward."""
    s = jnp.tanh(jnp.einsum("blh,h->bl", x, w[0]) + bias[0])      # (B, L)
    p = jax.nn.softmax(s, axis=-1)
    L = x.shape[1]
    mask = (jnp.arange(L)[None, :] < lengths[:, None]).astype(x.dtype)
    masked = p * mask
    scores = masked / jnp.sum(masked, axis=-1, keepdims=True)
    rep = jnp.sum(x * scores[..., None], axis=1)
    return rep, scores


if __name__ == "__main__":
    B, L, H = 2, 8, 32       # batch, sequence length, hidden (attention_size)

    key = jax.random.PRNGKey(0)
    kx, kw, kb = jax.random.split(key, 3)

    x = jax.random.normal(kx, (B, L, H), dtype=jnp.float32)
    lengths = jnp.array([8, 5], dtype=jnp.int32)

    # Deterministic Linear(H, 1) parameters; PyTorch weight layout is (1, H).
    bound = 1.0 / (H ** 0.5)
    w = jax.random.uniform(kw, (1, H), minval=-bound, maxval=bound, dtype=jnp.float32)
    bias = jax.random.uniform(kb, (1,), minval=-bound, maxval=bound, dtype=jnp.float32)

    rep, scores = jax.block_until_ready(
        jax.jit(self_attention_forward)(x, lengths, w, bias))

    rep_ref, scores_ref = _reference(x, lengths, w, bias)
    assert rep.shape == (B, H) and scores.shape == (B, L)
    assert jnp.allclose(rep, rep_ref, atol=1e-5, rtol=1e-5)
    assert jnp.allclose(scores, scores_ref, atol=1e-5, rtol=1e-5)

    print("KERNEL_OK")
</pallas_src>

<mosaic_0001>
module attributes {stable_mosaic.version = 11 : i64} {
  func.func @_self_attention_kernel(%arg0: i32, %arg1: memref<2x8x32xf32, #tpu.memory_space<vmem>>, %arg2: memref<1x32xf32, #tpu.memory_space<vmem>>, %arg3: memref<1xf32, #tpu.memory_space<smem>>, %arg4: memref<2x1xi32, #tpu.memory_space<vmem>>, %arg5: memref<2x32xf32, #tpu.memory_space<vmem>>, %arg6: memref<2x8xf32, #tpu.memory_space<vmem>>) attributes {dimension_semantics = [#tpu.dimension_semantics<parallel>], iteration_bounds = array<i64: 1>, scalar_prefetch = 0 : i64, scratch_operands = 0 : i64, tpu.core_type = #tpu.core_type<tc>, window_params = [{transform_indices = @transform_0, window_bounds = array<i64: 2, 8, 32>}, {pipeline_mode = #tpu.pipeline_mode<synchronous>, transform_indices = @transform_1, window_bounds = array<i64: 1, 32>}, {transform_indices = @transform_2, window_bounds = array<i64: 1>}, {transform_indices = @transform_3, window_bounds = array<i64: 2, 1>}, {transform_indices = @transform_4, window_bounds = array<i64: 2, 32>}, {transform_indices = @transform_5, window_bounds = array<i64: 2, 8>}]} {
    %c0 = arith.constant 0 : index
    %c0_0 = arith.constant 0 : index
    %c0_1 = arith.constant 0 : index
    %0 = vector.load %arg1[%c0, %c0_0, %c0_1] : memref<2x8x32xf32, #tpu.memory_space<vmem>>, vector<2x8x32xf32>
    %c0_2 = arith.constant 0 : index
    %c0_3 = arith.constant 0 : index
    %1 = vector.load %arg2[%c0_2, %c0_3] : memref<1x32xf32, #tpu.memory_space<vmem>>, vector<1x32xf32>
    %2 = vector.shape_cast %1 : vector<1x32xf32> to vector<1x1x32xf32>
    %3 = vector.broadcast %2 : vector<1x1x32xf32> to vector<2x8x32xf32>
    %4 = arith.mulf %0, %3 : vector<2x8x32xf32>
    %cst = arith.constant dense<0.000000e+00> : vector<2x8xf32>
    %5 = vector.multi_reduction <add>, %4, %cst [2] : vector<2x8x32xf32> to vector<2x8xf32>
    %c0_4 = arith.constant 0 : index
    %6 = memref.load %arg3[%c0_4] : memref<1xf32, #tpu.memory_space<smem>>
    %7 = vector.broadcast %6 : f32 to vector<2x8xf32>
    %8 = arith.addf %5, %7 : vector<2x8xf32>
    %9 = math.tanh %8 : vector<2x8xf32>
    %c0_5 = arith.constant 0 : index
    %c0_6 = arith.constant 0 : index
    %10 = vector.load %arg4[%c0_5, %c0_6] : memref<2x1xi32, #tpu.memory_space<vmem>>, vector<2x1xi32>
    %11 = tpu.iota {dimensions = array<i32: 1>} : vector<2x8xi32>
    %12 = vector.broadcast %10 : vector<2x1xi32> to vector<2x8xi32>
    %13 = arith.cmpi slt, %11, %12 : vector<2x8xi32>
    %cst_7 = arith.constant -1.000000e+30 : f32
    %14 = vector.broadcast %cst_7 : f32 to vector<2x8xf32>
    %15 = arith.select %13, %9, %14 : vector<2x8xi1>, vector<2x8xf32>
    %cst_8 = arith.constant dense<0xFF800000> : vector<2xf32>
    %16 = vector.multi_reduction <maximumf>, %15, %cst_8 [1] : vector<2x8xf32> to vector<2xf32>
    %17 = vector.shape_cast %16 : vector<2xf32> to vector<2x1xf32>
    %18 = vector.broadcast %17 : vector<2x1xf32> to vector<2x8xf32>
    %19 = arith.subf %15, %18 : vector<2x8xf32>
    %20 = math.exp %19 : vector<2x8xf32>
    %cst_9 = arith.constant dense<0.000000e+00> : vector<2xf32>
    %21 = vector.multi_reduction <add>, %20, %cst_9 [1] : vector<2x8xf32> to vector<2xf32>
    %22 = vector.shape_cast %21 : vector<2xf32> to vector<2x1xf32>
    %23 = tpu.reciprocal %22 : vector<2x1xf32> -> vector<2x1xf32>
    %24 = vector.broadcast %23 : vector<2x1xf32> to vector<2x8xf32>
    %25 = arith.mulf %20, %24 : vector<2x8xf32>
    %c0_10 = arith.constant 0 : index
    %c0_11 = arith.constant 0 : index
    %26 = vector.load %arg6[%c0_10, %c0_11] : memref<2x8xf32, #tpu.memory_space<vmem>>, vector<2x8xf32>
    tpu.vector_store %arg6[%c0_10, %c0_11], %25 {strides = array<i32>} : memref<2x8xf32, #tpu.memory_space<vmem>>, vector<2x8xf32>,
    %27 = vector.shape_cast %25 : vector<2x8xf32> to vector<2x8x1xf32>
    %28 = vector.broadcast %27 : vector<2x8x1xf32> to vector<2x8x32xf32>
    %29 = arith.mulf %0, %28 : vector<2x8x32xf32>
    %cst_12 = arith.constant dense<0.000000e+00> : vector<2x32xf32>
    %30 = vector.multi_reduction <add>, %29, %cst_12 [1] : vector<2x8x32xf32> to vector<2x32xf32>
    %c0_13 = arith.constant 0 : index
    %c0_14 = arith.constant 0 : index
    %31 = vector.load %arg5[%c0_13, %c0_14] : memref<2x32xf32, #tpu.memory_space<vmem>>, vector<2x32xf32>
    tpu.vector_store %arg5[%c0_13, %c0_14], %30 {strides = array<i32>} : memref<2x32xf32, #tpu.memory_space<vmem>>, vector<2x32xf32>,
    return
  }
  func.func @transform_0(%arg0: i32) -> (i32, i32, i32) {
    %c0_i32 = arith.constant 0 : i32
    %c0_i32_0 = arith.constant 0 : i32
    %c0_i32_1 = arith.constant 0 : i32
    return %arg0, %c0_i32, %c0_i32_0 : i32, i32, i32
  }
  func.func @transform_1(%arg0: i32) -> (i32, i32) {
    %c0_i32 = arith.constant 0 : i32
    %c0_i32_0 = arith.constant 0 : i32
    %c0_i32_1 = arith.constant 0 : i32
    return %c0_i32, %c0_i32_0 : i32, i32
  }
  func.func @transform_2(%arg0: i32) -> i32 {
    %c0_i32 = arith.constant 0 : i32
    %c0_i32_0 = arith.constant 0 : i32
    return %c0_i32 : i32
  }
  func.func @transform_3(%arg0: i32) -> (i32, i32) {
    %c0_i32 = arith.constant 0 : i32
    %c0_i32_0 = arith.constant 0 : i32
    return %arg0, %c0_i32 : i32, i32
  }
  func.func @transform_4(%arg0: i32) -> (i32, i32) {
    %c0_i32 = arith.constant 0 : i32
    %c0_i32_0 = arith.constant 0 : i32
    return %arg0, %c0_i32 : i32, i32
  }
  func.func @transform_5(%arg0: i32) -> (i32, i32) {
    %c0_i32 = arith.constant 0 : i32
    %c0_i32_0 = arith.constant 0 : i32
    return %arg0, %c0_i32 : i32, i32
  }
}

</mosaic_0001>

<bundles_post_ra>
// kernel: self_attention_forward.1
= control target key start
LH: loop header
LB: loop body
LE: loop exit
PB: predicated region body
PF: predicated region fallthrough
CT: control target
= control target key end

     0   :  { %12 = vsyncpa [#allocation4], 0  ;;  %s313_s0 = inlined_call_operand.hbm [shape: f32[2,8,32], index: 0, kind: input, shape index: {}]   ;;  %s314_s1 = inlined_call_operand.vmem [shape: f32[1,32], index: 1, kind: input, shape index: {}]   ;;  %s315_s2 = inlined_call_operand.<no memory space> [shape: f32[1], index: 2, kind: input, shape index: {}]   ;;  %s316_s3 = inlined_call_operand.vmem [shape: s32[2,1], index: 3, kind: input, shape index: {}]   ;;  %s317_s4 = inlined_call_operand.hbm [shape: f32[2,32], index: 4, kind: output, shape index: {0}]   ;;  %s318_s5 = inlined_call_operand.hbm [shape: f32[2,8], index: 5, kind: output, shape index: {1}]  }
   0x1   :  { %13 = vsyncpa [#allocation5], 0 }
   0x2   :  { %14 = vsyncpa [#allocation8], 0  ;;  %s242_s18 = smov [#allocation3]  }
   0x3   :  { %s20_s19 = sshll.u32 %s242_s18, 4  ;;  %s21_s19 = int_to_ptr.vmem [resolvable:$true] %s20_s19 }
   0x4   :  { %s184_s20 = scalar_lea.vmem %s21_s19, 256  ;;  %p189_p1 = scmp.lt.s32.totalorder %s21_s19, %s21_s19 }
   0x5   :  { %p185_p0 = scmp.ne.s32.totalorder %s21_s19, %s184_s20  ;;  %p190_p2 = scmp.lt.s32.totalorder %s184_s20, %s184_s20 }
   0x7   :  { %p191_p3 = por %p190_p2, %p189_p1 }
   0x9   :  { %p192_p4 = pnand %p191_p3, %p185_p0 }
   0xb   :  { %195 = shalt.err (!%p192_p4)
}
   0xc   :  { %s243_s21 = smov 128   ;;  %s244_s22 = smov 8  }
   0xd   :  { %26 = dma.hbm_to_vmem [thread:$0]  %s313_s0, 256, %s21_s19, [#allocation4], %s243_s21, %s243_s21, %s244_s22  }
   0xe   :  { %236 = dma.done.wait [#allocation4], 256  }
   0xf   :  { %237 = vsyncadd [#allocation4], 4294967040  ;;  %v245_v0 = vmov 0   ;;  %v281_v1 = vld [vmem:[#allocation3] sm:$0xff]  ;;  %vm47_vm0 = vcmask 261120   ;;  %v286_v3 = vld [vmem:[#allocation3 + $0x8] sm:$0xff]  ;;  %v55_v9 = vstv %s315_s2  ;;  %v61_v14 = vlaneseq }
  0x10   :  { %166 = vset.pattern.permute.xlu1 %v245_v0  ;;  %167 = vset.pattern.permute.xlu0 %v245_v0  ;;  %v159_v2 = vld [vmem:[%s314_s1] ss:$0 sm:$0xff]  ;;  %vm77_vm1 = vcmask 1041409   ;;  %vm81_vm3 = vcmask 58368   ;;  %s246_s2 = smov [#allocation7]  }
  0x11   :  { %v45_v4 = vmul.f32 %v159_v2, %v281_v1  ;;  %v46_v5 = vmul.f32 %v159_v2, %v286_v3  ;;  %v60_v6 = vld [vmem:[%s316_s3] sm:$0x3]  ;;  %v62_v15 = vand.u32 127, %v61_v14  ;;  %v70_v16 = vshrl.u32 %v61_v14, 7  ;;  %s146_s3 = sshll.u32 %s246_s2, 4  ;;  %s147_s3 = int_to_ptr.vmem [resolvable:$true] %s146_s3 }
  0x12   :  { %64 = vperm.xlu1 %166, %v60_v6   ;;  %s196_s29 = scalar_lea.vmem %s147_s3, 32  ;;  %p201_p6 = scmp.lt.s32.totalorder %s147_s3, %s147_s3 }
  0x13   :  { %v48_v7 = vsel %vm47_vm0, %v45_v4, 0.0  ;;  %v51_v8 = vsel %vm47_vm0, %v46_v5, 0.0  ;;  %v71_v17 = vsub.s32 %v62_v15, %v70_v16  ;;  %v96_v32 = vsub.s32 0, %v70_v16  ;;  %p197_p5 = scmp.ne.s32.totalorder %s147_s3, %s196_s29  ;;  %p202_p7 = scmp.lt.s32.totalorder %s196_s29, %s196_s29 }
  0x14   :  { %49 = vadd.xlane.f32.xlu0 %v48_v7  ;;  %v103_v36 = vsub.s32 1, %v70_v16 }
  0x15   :  { %p203_p8 = por %p202_p7, %p201_p6 }
  0x17   :  { %p204_p9 = pnand %p203_p8, %p197_p5 }
  0x18   :  { %52 = vadd.xlane.f32.xlu0 %v51_v8 }
  0x8d   :  { %v65_v19 = vpop.permute.xlu1 %64 }
  0x8e   :  { %vm66_vm2 = vcmp.lt.s32.totalorder %v62_v15, %v65_v19 }
  0x9d   :  { %v50_v10 = vpop.xlane.xlu0 %49 }
  0x9e   :  { %v56_v11 = vadd.f32 %v55_v9, %v50_v10 }
  0xa0   :  { %168 = vtanh.f32 %v56_v11 }
  0xa1   :  { %v53_v12 = vpop.xlane.xlu0 %52 }
  0xa2   :  { %v57_v13 = vadd.f32 %v55_v9, %v53_v12 }
  0xa4   :  { %170 = vtanh.f32 %v57_v13 }
  0xad   :  { %v169_v18 = vpop.eup %168 }
  0xae   :  { %v72_v21 = vrot.slane %v169_v18, %v71_v17 }
  0xb1   :  { %v171_v20 = vpop.eup %170 }
  0xb2   :  { %v76_v22 = vrot.slane %v171_v20, %v71_v17 }
  0xb4   :  { %v78_v23 = vsel %vm77_vm1, %v76_v22, %v72_v21 }
  0xb5   :  { %v80_v24 = vsel %vm66_vm2, %v78_v23, -1e+30 }
  0xb6   :  { %v82_v25 = vsel %vm81_vm3, %v80_v24, -inf }
  0xb7   :  { %83 = vmax.xlane.f32.xlu1 %v82_v25 }
 0x140   :  { %v84_v26 = vpop.xlane.xlu1 %83 }
 0x141   :  { %v85_v27 = vsub.f32 %v80_v24, %v84_v26 }
 0x143   :  { %v86_v28 = vmul.f32 1.442695, %v85_v27 }
 0x145   :  { %172 = vpow2.f32 %v86_v28 }
 0x152   :  { %v173_v29 = vpop.eup %172 }
 0x153   :  { %v88_v30 = vsel %vm81_vm3, %v173_v29, 0.0 }
 0x154   :  { %89 = vadd.xlane.f32.xlu0 %v88_v30 }
 0x1dd   :  { %v90_v31 = vpop.xlane.xlu0 %89 }
 0x1de   :  { %174 = vrcp.f32 %v90_v31 }
 0x1eb   :  { %v175_v33 = vpop.eup %174 }
 0x1ec   :  { %v92_v34 = vmul.f32 %v175_v33, %v173_v29 }
 0x1ee   :  { %v97_v35 = vrot.slane %v92_v34, %v96_v32  ;;  %93 = vst.msk [vmem:[#allocation7] sm:$0x3] %vm81_vm3, %v92_v34  ;;  %v104_v37 = vrot.slane %v92_v34, %v103_v36 }
 0x1f0   :  { %99 = vbcast.lane.b32.xlu0 %v97_v35, 256 }
 0x1f4   :  { %106 = vbcast.lane.b32.xlu0 %v104_v37, 256 }
 0x1f5   :  { %207 = shalt.err (!%p204_p9)
}
 0x1f6   :  { %149 = dma.vmem_to_hbm [thread:$0]  %s147_s3, 32, %s318_s5, [#allocation8]   ;;  %vm128_vm4 = vcmask 254976  }
 0x1f7   :  { %s247_s5 = smov [#allocation6]  }
 0x1f8   :  { %s136_s7 = sshll.u32 %s247_s5, 4  ;;  %s137_s7 = int_to_ptr.vmem [resolvable:$true] %s136_s7 }
 0x1f9   :  { %s216_s8 = scalar_lea.vmem %s137_s7, 32  ;;  %p221_p11 = scmp.lt.s32.totalorder %s137_s7, %s137_s7 }
 0x1fa   :  { %p217_p10 = scmp.ne.s32.totalorder %s137_s7, %s216_s8  ;;  %p222_p12 = scmp.lt.s32.totalorder %s216_s8, %s216_s8 }
 0x1fc   :  { %p223_p13 = por %p222_p12, %p221_p11 }
 0x1fe   :  { %p224_p0 = pnand %p223_p13, %p217_p10 }
 0x262   :  { %v100_v38 = vpop.permute.xlu0 %99 }
 0x263   :  { %v108_v39 = vmul.f32 %v100_v38, %v281_v1 }
 0x265   :  { %v110_v40 = vsel %vm47_vm0, %v108_v39, 0.0 }
 0x266   :  { %v111_v41 = vrot.slane %v110_v40, 4  ;;  %v107_v42 = vpop.permute.xlu0 %106 }
 0x267   :  { %v109_v43 = vmul.f32 %v107_v42, %v286_v3 }
 0x268   :  { %v112_v44 = vadd.f32 %v111_v41, %v110_v40 }
 0x269   :  { %v117_v45 = vsel %vm47_vm0, %v109_v43, 0.0 }
 0x26a   :  { %v113_v46 = vrot.slane %v112_v44, 2  ;;  %v118_v47 = vrot.slane %v117_v45, 4 }
 0x26c   :  { %v114_v48 = vadd.f32 %v113_v46, %v112_v44  ;;  %v119_v49 = vadd.f32 %v118_v47, %v117_v45 }
 0x26e   :  { %v120_v50 = vrot.slane %v119_v49, 2  ;;  %v115_v51 = vrot.slane %v114_v48, 1 }
 0x270   :  { %v121_v52 = vadd.f32 %v120_v50, %v119_v49  ;;  %v116_v54 = vadd.f32 %v115_v51, %v114_v48 }
 0x272   :  { %v122_v53 = vrot.slane %v121_v52, 1 }
 0x274   :  { %v123_v55 = vadd.f32 %v122_v53, %v121_v52 }
 0x276   :  { %v126_v56 = vsel %vm77_vm1, %v123_v55, %v116_v54 }
 0x277   :  { %129 = vst.msk [vmem:[#allocation6] sm:$0x3] %vm128_vm4, %v126_v56 }
 0x278   :  { %227 = shalt.err (!%p224_p0)
}
 0x279   :  { %139 = dma.vmem_to_hbm [thread:$0]  %s137_s7, 32, %s317_s4, [#allocation5]  }
 0x27a   :  { %238 = dma.done.wait [#allocation5], 32  }
 0x27b   :  { %239 = vsyncadd [#allocation5], 4294967264 }
 0x27c   :  { %240 = dma.done.wait [#allocation8], 32  }
 0x27d   :  { %241 = vsyncadd [#allocation8], 4294967264 }
 0x27e   :  { %156 = vsyncpa [#allocation4], 1 }
 0x27f   :  { %157 = vsyncpa [#allocation5], 1 }
 0x280   :  { %158 = vsyncpa [#allocation8], 1 }

</bundles_post_ra>
